<compile_context>
chip_gen: v6e
topology: v6e:2x2x1
jax: 0.10.0
libtpu: 0.0.40
codegen_flags: <defaults>
</compile_context>

<pallas_src>
import math

import jax
import jax.numpy as jnp
from jax.experimental import pallas as pl
from jax.experimental.pallas import tpu as pltpu

LANE = 128  # lane width / feature-axis alignment


def _round_up(x, m):
    return ((x + m - 1) // m) * m


# ----------------------------------------------------------------------------
# Pallas kernel: residual MLP flow over a (tm, D) row tile.
#   x_ref  : (tm, D)  bf16
#   t_ref  : (tm, 1)  f32
#   w1     : (D, Hp)  bf16
#   w1t    : (1, Hp)  f32
#   b1     : (1, Hp)  f32
#   w2     : (Hp, D)  bf16
#   b2     : (1, D)   f32
#   o_ref  : (tm, D)  bf16
# ----------------------------------------------------------------------------
def _solver_kernel(x_ref, t_ref, w1_ref, w1t_ref, b1_ref, w2_ref, b2_ref, o_ref):
    x = x_ref[...]                                               # bf16 (tm, D)
    # First matmul (MXU, bf16 operands, f32 accumulation) + time outer product
    # on the VPU (huge slack) + bias, then tanh on the EUP in f32.
    h = jnp.dot(x, w1_ref[...], preferred_element_type=jnp.float32)   # (tm, Hp)
    h = jnp.tanh(h + t_ref[...] * w1t_ref[...] + b1_ref[...])
    # Second matmul back to D, then residual in f32; store bf16.
    y = jnp.dot(h.astype(jnp.bfloat16), w2_ref[...],
                preferred_element_type=jnp.float32)                   # (tm, D)
    o_ref[...] = (x.astype(jnp.float32) + y + b2_ref[...]).astype(o_ref.dtype)


def _choose_tile(M, cap=1024):
    """Largest row tile up to `cap`, but keep >= 2 grid steps for modest M so
    both v7x TensorCores get work; always a multiple of 8 sublanes."""
    if M <= 8:
        return 8
    return min(cap, _round_up(pl.cdiv(M, 2), 8))


def _vmem_limit_bytes(tm, D, Hp, weight_bufs):
    """Actual-footprint-derived VMEM limit with 2x headroom, clamped to a
    range that is safe on v5e/v6e (128 MiB) and v7x (64 MiB)."""
    lane = lambda n: _round_up(max(n, 1), LANE)
    sub = lambda n: _round_up(max(n, 1), 8)
    act = 2 * tm * (2 * lane(D) * 2 + lane(1) * 4)          # x,out bf16 + t f32, double-buffered
    inter = tm * Hp * 4                                      # h intermediate (f32)
    wts = weight_bufs * ((sub(D) * Hp + Hp * lane(D)) * 2    # w1, w2 (bf16)
                         + (2 * sub(1) * Hp + sub(1) * lane(D)) * 4)  # w1t, b1, b2 (f32)
    est = act + inter + wts
    return int(min(40 * 1024 * 1024, max(16 * 1024 * 1024, 2 * est)))


def _pallas_solver(x2d, t2d, packed):
    """x2d: (M, D) bf16, t2d: (M, 1) f32.  Returns (M, D) bf16."""
    M, D = x2d.shape
    Hp = packed["w1"].shape[1]

    tm = _choose_tile(M)
    num_tiles = pl.cdiv(M, tm)        # ragged last block handled by edge semantics

    lane = lambda n: _round_up(max(n, 1), LANE)
    sub = lambda n: _round_up(max(n, 1), 8)
    # Single-buffer the grid-invariant weights only when their double-buffered
    # footprint is big enough to pressure VMEM (v7x 64 MiB guard); at small
    # D/H keep the default pipeline.
    w_bytes_2buf = 2 * ((sub(D) * Hp + Hp * lane(D)) * 2
                        + (2 * sub(1) * Hp + sub(1) * lane(D)) * 4)
    single_buf_weights = w_bytes_2buf > (4 << 20)
    weight_bufs = 1 if single_buf_weights else 2

    def wspec(shape):
        if single_buf_weights:
            return pl.BlockSpec(shape, lambda i: (0, 0), pipeline_mode=pl.Buffered(1))
        return pl.BlockSpec(shape, lambda i: (0, 0))

    cost = pl.CostEstimate(
        flops=2 * M * (D * Hp + Hp * D),
        transcendentals=M * Hp,
        bytes_accessed=(2 * M * D * 2            # x in + y out (bf16)
                        + M * 4                   # t (f32)
                        + 2 * D * Hp * 2          # bf16 weights
                        + (2 * Hp + D) * 4),      # f32 w1t/b1/b2
    )

    out = pl.pallas_call(
        _solver_kernel,
        out_shape=jax.ShapeDtypeStruct((M, D), jnp.bfloat16),
        grid_spec=pltpu.PrefetchScalarGridSpec(
            num_scalar_prefetch=0,
            grid=(num_tiles,),
            in_specs=[
                pl.BlockSpec((tm, D), lambda i: (i, 0)),   # x row tile (bf16)
                pl.BlockSpec((tm, 1), lambda i: (i, 0)),   # t row tile (f32)
                wspec((D, Hp)),                            # w1  (bf16)
                wspec((1, Hp)),                            # w1t (f32)
                wspec((1, Hp)),                            # b1  (f32)
                wspec((Hp, D)),                            # w2  (bf16)
                wspec((1, D)),                             # b2  (f32)
            ],
            out_specs=pl.BlockSpec((tm, D), lambda i: (i, 0)),
        ),
        compiler_params=pltpu.CompilerParams(
            dimension_semantics=("parallel",),             # row tiles shard across TCs (v7x)
            vmem_limit_bytes=_vmem_limit_bytes(tm, D, Hp, weight_bufs),
        ),
        cost_estimate=cost,
    )(x2d, t2d, packed["w1"], packed["w1t"], packed["b1"],
      packed["w2"], packed["b2"])
    return out


# ----------------------------------------------------------------------------
# The injected `solver`: forward(x, t) with x (..., 1, D), t broadcastable to
# (..., 1, 1).
# ----------------------------------------------------------------------------
def solver_apply(packed, x, t):
    D = packed["D"]
    lead = x.shape[:-1]                          # (..., 1)
    M = math.prod(lead)
    x2d = x.reshape(M, D)
    if x2d.dtype != jnp.bfloat16:
        # One-time cast; in a real pipeline this fuses with the producer.
        x2d = x2d.astype(jnp.bfloat16)
    t2d = jnp.broadcast_to(t, lead + (1,)).reshape(M, 1).astype(jnp.float32)
    y2d = _pallas_solver(x2d, t2d, packed)
    return y2d.reshape(lead + (D,))              # bf16 output of the flow


# ----------------------------------------------------------------------------
# SolverWrapper.forward — exact port of the torch shape logic.
# ----------------------------------------------------------------------------
def solver_wrapper_forward(packed, x, t, backwards=False):
    x = jnp.expand_dims(x, axis=-2)                             # x.unsqueeze(-2)
    t = jnp.expand_dims(jnp.expand_dims(t, axis=-1), axis=2)    # t.unsqueeze(-1).unsqueeze(2)
    if t.shape[-3] != x.shape[-3]:
        t = jnp.repeat(t, x.shape[-3], axis=-3)                 # repeat_interleave(dim=-3)
    if len(x.shape) == 4:
        # NOTE: like the torch original, this assumes t's leading dim is 1.
        t = jnp.repeat(t, x.shape[0], axis=0)                   # repeat_interleave(dim=0)
    return solver_apply(packed, x, t)


# ----------------------------------------------------------------------------
# Parameters: f32 "master" weights + one-time lane-padded bf16 packing.
# ----------------------------------------------------------------------------
def init_solver_params(key, D, H):
    k1, k2, k3 = jax.random.split(key, 3)
    return {
        "w1x": jax.random.normal(k1, (D, H), jnp.float32) * (1.0 / D ** 0.5),
        "w1t": jax.random.normal(k2, (1, H), jnp.float32) * 0.1,
        "b1": jnp.zeros((1, H), jnp.float32),
        "w2": jax.random.normal(k3, (H, D), jnp.float32) * (1.0 / H ** 0.5),
        "b2": jnp.zeros((1, D), jnp.float32),
    }


def pack_solver_params(params):
    D, H = params["w1x"].shape
    Hp = _round_up(H, LANE)          # hidden lane-padded once; padded cols are inert
    w1 = jnp.zeros((D, Hp), jnp.float32).at[:, :H].set(params["w1x"])
    w1t = jnp.zeros((1, Hp), jnp.float32).at[:, :H].set(params["w1t"])
    b1 = jnp.zeros((1, Hp), jnp.float32).at[:, :H].set(params["b1"])
    w2 = jnp.zeros((Hp, D), jnp.float32).at[:H, :].set(params["w2"])
    b2 = params["b2"].astype(jnp.float32)
    return {
        "w1": w1.astype(jnp.bfloat16), "w1t": w1t, "b1": b1,
        "w2": w2.astype(jnp.bfloat16), "b2": b2,
        "D": D, "H": H, "Hp": Hp,
    }


# ----------------------------------------------------------------------------
# Pure-JAX f32 reference of wrapper + solver (kernel uses bf16 matmul operands
# and bf16 activation storage, so tolerance accounts for bf16 rounding).
# ----------------------------------------------------------------------------
def _reference(params, x, t):
    x = jnp.expand_dims(x, axis=-2)
    t = jnp.expand_dims(jnp.expand_dims(t, axis=-1), axis=2)
    if t.shape[-3] != x.shape[-3]:
        t = jnp.repeat(t, x.shape[-3], axis=-3)
    if len(x.shape) == 4:
        t = jnp.repeat(t, x.shape[0], axis=0)
    tb = jnp.broadcast_to(t, x.shape[:-1] + (1,))
    h = jnp.tanh(x @ params["w1x"] + tb * params["w1t"] + params["b1"])
    return x + h @ params["w2"] + params["b2"]


if __name__ == "__main__":
    key = jax.random.PRNGKey(0)
    kx, kt, kx2, kt2, kp = jax.random.split(key, 5)

    D, H = 32, 64
    params = init_solver_params(kp, D, H)
    packed = pack_solver_params(params)

    # Case 1: x (B, N, D) latent states; t (1, N) times shared across batch
    # (exercises both repeat_interleave branches like the torch module).
    B, N = 2, 8
    x = jax.random.normal(kx, (B, N, D), jnp.float32)
    t = jax.random.uniform(kt, (1, N), jnp.float32)
    y = jax.block_until_ready(solver_wrapper_forward(packed, x, t))
    y_ref = _reference(params, x, t)
    assert y.shape == (B, N, 1, D), y.shape
    # bf16 matmul operands + bf16 activation storage w/ f32 accumulation.
    assert jnp.allclose(y.astype(jnp.float32), y_ref, atol=1.5e-1, rtol=2e-2), float(
        jnp.max(jnp.abs(y.astype(jnp.float32) - y_ref)))

    # Case 2: M % tm != 0 (ragged last grid block handled by edge semantics).
    B2, N2 = 3, 7
    x2 = jax.random.normal(kx2, (B2, N2, D), jnp.float32)
    t2 = jax.random.uniform(kt2, (1, N2), jnp.float32)
    y2 = jax.block_until_ready(solver_wrapper_forward(packed, x2, t2))
    y2_ref = _reference(params, x2, t2)
    assert y2.shape == (B2, N2, 1, D), y2.shape
    assert jnp.allclose(y2.astype(jnp.float32), y2_ref, atol=1.5e-1, rtol=2e-2), float(
        jnp.max(jnp.abs(y2.astype(jnp.float32) - y2_ref)))

    # TODO(synk): the original `solver` is constructor-injected (e.g. a
    # CouplingFlow / ResNetFlow); a deterministic residual-MLP flow stands in.
    print("KERNEL_OK")
</pallas_src>

<mosaic_0001>
module attributes {stable_mosaic.version = 11 : i64} {
  func.func @_solver_kernel(%arg0: i32, %arg1: memref<8x32xbf16, #tpu.memory_space<vmem>>, %arg2: memref<8x1xf32, #tpu.memory_space<vmem>>, %arg3: memref<32x128xbf16, #tpu.memory_space<vmem>>, %arg4: memref<1x128xf32, #tpu.memory_space<vmem>>, %arg5: memref<1x128xf32, #tpu.memory_space<vmem>>, %arg6: memref<128x32xbf16, #tpu.memory_space<vmem>>, %arg7: memref<1x32xf32, #tpu.memory_space<vmem>>, %arg8: memref<8x32xbf16, #tpu.memory_space<vmem>>) attributes {dimension_semantics = [#tpu.dimension_semantics<parallel>], iteration_bounds = array<i64: 2>, scalar_prefetch = 0 : i64, scratch_operands = 0 : i64, tpu.core_type = #tpu.core_type<tc>, window_params = [{transform_indices = @transform_0, window_bounds = array<i64: 8, 32>}, {transform_indices = @transform_1, window_bounds = array<i64: 8, 1>}, {pipeline_mode = #tpu.pipeline_mode<synchronous>, transform_indices = @transform_2, window_bounds = array<i64: 32, 128>}, {pipeline_mode = #tpu.pipeline_mode<synchronous>, transform_indices = @transform_3, window_bounds = array<i64: 1, 128>}, {pipeline_mode = #tpu.pipeline_mode<synchronous>, transform_indices = @transform_4, window_bounds = array<i64: 1, 128>}, {pipeline_mode = #tpu.pipeline_mode<synchronous>, transform_indices = @transform_5, window_bounds = array<i64: 128, 32>}, {pipeline_mode = #tpu.pipeline_mode<synchronous>, transform_indices = @transform_6, window_bounds = array<i64: 1, 32>}, {transform_indices = @transform_7, window_bounds = array<i64: 8, 32>}]} {
    %c0 = arith.constant 0 : index
    %c0_0 = arith.constant 0 : index
    %0 = vector.load %arg1[%c0, %c0_0] : memref<8x32xbf16, #tpu.memory_space<vmem>>, vector<8x32xbf16>
    %c0_1 = arith.constant 0 : index
    %c0_2 = arith.constant 0 : index
    %1 = vector.load %arg3[%c0_1, %c0_2] : memref<32x128xbf16, #tpu.memory_space<vmem>>, vector<32x128xbf16>
    %cst = arith.constant dense<0.000000e+00> : vector<8x128xf32>
    %2 = tpu.matmul %0, %1, %cst {dimension_numbers = #tpu.dot_dimension_numbers<[1], [0], [0], [1], [0, 0, 1, 1], [], []>} : vector<8x32xbf16>, vector<32x128xbf16>, vector<8x128xf32> -> vector<8x128xf32>
    %c0_3 = arith.constant 0 : index
    %c0_4 = arith.constant 0 : index
    %3 = vector.load %arg2[%c0_3, %c0_4] : memref<8x1xf32, #tpu.memory_space<vmem>>, vector<8x1xf32>
    %c0_5 = arith.constant 0 : index
    %c0_6 = arith.constant 0 : index
    %4 = vector.load %arg4[%c0_5, %c0_6] : memref<1x128xf32, #tpu.memory_space<vmem>>, vector<1x128xf32>
    %5 = vector.broadcast %3 : vector<8x1xf32> to vector<8x128xf32>
    %6 = vector.broadcast %4 : vector<1x128xf32> to vector<8x128xf32>
    %7 = arith.mulf %5, %6 : vector<8x128xf32>
    %8 = arith.addf %2, %7 : vector<8x128xf32>
    %c0_7 = arith.constant 0 : index
    %c0_8 = arith.constant 0 : index
    %9 = vector.load %arg5[%c0_7, %c0_8] : memref<1x128xf32, #tpu.memory_space<vmem>>, vector<1x128xf32>
    %10 = vector.broadcast %9 : vector<1x128xf32> to vector<8x128xf32>
    %11 = arith.addf %8, %10 : vector<8x128xf32>
    %12 = math.tanh %11 : vector<8x128xf32>
    %13 = arith.truncf %12 : vector<8x128xf32> to vector<8x128xbf16>
    %c0_9 = arith.constant 0 : index
    %c0_10 = arith.constant 0 : index
    %14 = vector.load %arg6[%c0_9, %c0_10] : memref<128x32xbf16, #tpu.memory_space<vmem>>, vector<128x32xbf16>
    %cst_11 = arith.constant dense<0.000000e+00> : vector<8x32xf32>
    %15 = tpu.matmul %13, %14, %cst_11 {dimension_numbers = #tpu.dot_dimension_numbers<[1], [0], [0], [1], [0, 0, 1, 1], [], []>} : vector<8x128xbf16>, vector<128x32xbf16>, vector<8x32xf32> -> vector<8x32xf32>
    %16 = arith.extf %0 : vector<8x32xbf16> to vector<8x32xf32>
    %17 = arith.addf %16, %15 : vector<8x32xf32>
    %c0_12 = arith.constant 0 : index
    %c0_13 = arith.constant 0 : index
    %18 = vector.load %arg7[%c0_12, %c0_13] : memref<1x32xf32, #tpu.memory_space<vmem>>, vector<1x32xf32>
    %19 = vector.broadcast %18 : vector<1x32xf32> to vector<8x32xf32>
    %20 = arith.addf %17, %19 : vector<8x32xf32>
    %21 = arith.truncf %20 : vector<8x32xf32> to vector<8x32xbf16>
    %c0_14 = arith.constant 0 : index
    %c0_15 = arith.constant 0 : index
    %22 = vector.load %arg8[%c0_14, %c0_15] : memref<8x32xbf16, #tpu.memory_space<vmem>>, vector<8x32xbf16>
    tpu.vector_store %arg8[%c0_14, %c0_15], %21 {strides = array<i32>} : memref<8x32xbf16, #tpu.memory_space<vmem>>, vector<8x32xbf16>,
    return
  }
  func.func @transform_0(%arg0: i32) -> (i32, i32) {
    %c0_i32 = arith.constant 0 : i32
    %c0_i32_0 = arith.constant 0 : i32
    return %arg0, %c0_i32 : i32, i32
  }
  func.func @transform_1(%arg0: i32) -> (i32, i32) {
    %c0_i32 = arith.constant 0 : i32
    %c0_i32_0 = arith.constant 0 : i32
    return %arg0, %c0_i32 : i32, i32
  }
  func.func @transform_2(%arg0: i32) -> (i32, i32) {
    %c0_i32 = arith.constant 0 : i32
    %c0_i32_0 = arith.constant 0 : i32
    %c0_i32_1 = arith.constant 0 : i32
    return %c0_i32, %c0_i32_0 : i32, i32
  }
  func.func @transform_3(%arg0: i32) -> (i32, i32) {
    %c0_i32 = arith.constant 0 : i32
    %c0_i32_0 = arith.constant 0 : i32
    %c0_i32_1 = arith.constant 0 : i32
    return %c0_i32, %c0_i32_0 : i32, i32
  }
  func.func @transform_4(%arg0: i32) -> (i32, i32) {
    %c0_i32 = arith.constant 0 : i32
    %c0_i32_0 = arith.constant 0 : i32
    %c0_i32_1 = arith.constant 0 : i32
    return %c0_i32, %c0_i32_0 : i32, i32
  }
  func.func @transform_5(%arg0: i32) -> (i32, i32) {
    %c0_i32 = arith.constant 0 : i32
    %c0_i32_0 = arith.constant 0 : i32
    %c0_i32_1 = arith.constant 0 : i32
    return %c0_i32, %c0_i32_0 : i32, i32
  }
  func.func @transform_6(%arg0: i32) -> (i32, i32) {
    %c0_i32 = arith.constant 0 : i32
    %c0_i32_0 = arith.constant 0 : i32
    %c0_i32_1 = arith.constant 0 : i32
    return %c0_i32, %c0_i32_0 : i32, i32
  }
  func.func @transform_7(%arg0: i32) -> (i32, i32) {
    %c0_i32 = arith.constant 0 : i32
    %c0_i32_0 = arith.constant 0 : i32
    return %arg0, %c0_i32 : i32, i32
  }
}

</mosaic_0001>

<bundles_post_ra>
// kernel: tpu_custom_call.1
= control target key start
LH: loop header
LB: loop body
LE: loop exit
PB: predicated region body
PF: predicated region fallthrough
CT: control target
= control target key end

     0   :  { %12 = vsyncpa [#allocation3], 0  ;;  %s940_s0 = inlined_call_operand.vmem [shape: bf16[16,32], index: 0, kind: input, shape index: {}]   ;;  %s941_s1 = inlined_call_operand.vmem [shape: f32[16,1], index: 1, kind: input, shape index: {}]   ;;  %s942_s2 = inlined_call_operand.vmem [shape: bf16[32,128], index: 2, kind: input, shape index: {}]   ;;  %s943_s3 = inlined_call_operand.vmem [shape: f32[1,128], index: 3, kind: input, shape index: {}]   ;;  %s944_s4 = inlined_call_operand.vmem [shape: f32[1,128], index: 4, kind: input, shape index: {}]   ;;  %s945_s5 = inlined_call_operand.vmem [shape: bf16[128,32], index: 5, kind: input, shape index: {}]   ;;  %s946_s6 = inlined_call_operand.vmem [shape: f32[1,32], index: 6, kind: input, shape index: {}]   ;;  %s947_s7 = inlined_call_operand.hbm [shape: bf16[16,32], index: 7, kind: output, shape index: {}]  }
   0x1   :  { %14 = vsyncpa [#allocation3 + $0x1], 0  ;;  %s805_s24 = smov 0   ;;  %s807_s25 = smov 0  }
   0x2   :  { %s809_s26 = smov 0   ;;  %s811_s27 = smov 0  }
   0x3 LB: > { %s826_s28 = sadd.s32 4294967295, %s759_s27   ;;  %s579_s29 = sadd.s32 4294967294, %s759_s27   ;;  %s759_s27 = sphi %s811_s27, %s953_s27   ;;  %s755_s26 = sphi %s809_s26, %s952_s26   ;;  %s751_s25 = sphi %s807_s25, %s951_s25   ;;  %s747_s24 = sphi %s805_s24, %s950_s24  }
   0x4   : > { %s830_s30 = sadd.s32 1, %s759_s27   ;;  %s184_s8 = sadd.s32 1, %s755_s26 }
   0x5   : > { %s181_s9 = ssub.s32 %s759_s27, %s830_s30  ;;  %p194_p0 = scmp.ne.s32.totalorder %s755_s26, %s751_s25 }
   0x6   : > { %p182_p1 = scmp.eq.s32.totalorder %s181_s9, 0  ;;  %p195_p2 = scmp.eq.s32.totalorder %s826_s28, 1 }
   0x7   : > { %p200_p3 = scmp.ne.s32.totalorder %s751_s25, %s747_s24  ;;  %p201_p4 = scmp.eq.s32.totalorder %s579_s29, 1 }
   0x8   : > { %s841_s10 = scalar_select %p182_p1, %s755_s26, %s184_s8  }
   0x9   : > { %p843_p5 = por %p195_p2, %p194_p0  ;;  %p847_p6 = por %p201_p4, %p200_p3 }
   0xa   : > { %p582_p7 = scmp.ge.s32.totalorder %s759_s27, 1  ;;  %p248_p8 = scmp.lt.s32.totalorder %s759_s27, 3 }
   0xc   : > { %p249_p9 = pnand %p582_p7, %p248_p8 }
   0xd   : > { %p283_p10 = scmp.lt.s32.totalorder (!%p249_p9), %s826_s28, 1  ;;  %s280_s18 = sand.u32 (!%p249_p9), 1, %s751_s25  }
   0xe   : > { %252 = sbr.rel (%p249_p9) target bundleno = 453 (0x1c5), region = 48 }
  0x13   : > { %v687_v0 = vld [vmem:[%s942_s2 + $0x8] sm:$0xff]   ;;  %v761_v1 = vmov 0.0   ;;  %v688_v2 = vld [vmem:[%s942_s2] sm:$0xff]   ;;  %vm762_vm0 = vmmov 0   ;;  %v689_v3 = vld [vmem:[%s945_s5 + $0x38] sm:$0xff]   ;;  %v763_v4 = vmov 0  }
  0x14   : > { %616 = vmatprep.subr.bf16.mxu0 %v761_v1  ;;  %624 = vmatprep.subr.bf16.mxu1 %v761_v1  ;;  %s284_s19 = scalar_select %p283_p10, %s826_s28, 1  ;;  %v690_v5 = vld [vmem:[%s945_s5 + $0x30] sm:$0xff]   ;;  %vm323_vm1 = vcmask 261120   ;;  %v691_v6 = vld [vmem:[%s945_s5 + $0x28] sm:$0xff]   ;;  %v692_v9 = vld [vmem:[%s945_s5 + $0x20] sm:$0xff]   ;;  %vm492_vm2 = vcmask 257024  }
  0x15   : > { %617 = vmatpush3.bf16.msra.mxu0 %v687_v0  ;;  %620 = vmatprep.mubr.msk.bf16.mxu0 %vm762_vm0, %v761_v1  ;;  %v693_v10 = vld [vmem:[%s945_s5 + $0x18] sm:$0xff]   ;;  %v694_v11 = vld [vmem:[%s945_s5 + $0x10] sm:$0xff]   ;;  %v695_v12 = vld [vmem:[%s945_s5 + $0x8] sm:$0xff]  }
  0x16   : > { %618 = vmatprep.subr.bf16.mxu0 %v761_v1  ;;  %686 = vset.pattern.permute.xlu0 %v763_v4  ;;  %s584_s22 = sshll.u32 %s284_s19, 2  ;;  %s585_s23 = sshll.u32 %s284_s19, 3  ;;  %v696_v13 = vld [vmem:[%s945_s5] sm:$0xff]  }
  0x17   : > { %625 = vmatpush3.bf16.msra.mxu1 %v689_v3  ;;  %640 = vmatprep.mubr.msk.bf16.mxu1 %vm762_vm0, %v761_v1  ;;  %s286_s14 = scalar_lea.vmem %s940_s0, %s584_s22  ;;  %s290_s17 = scalar_lea.vmem %s941_s1, %s585_s23  ;;  %v586_v14 = vld [vmem:[%s943_s3] ss:$0 sm:$0xff] }
  0x18   : > { %626 = vmatprep.subr.bf16.mxu1 %v761_v1  ;;  %v292_v7 = vld [vmem:[%s286_s14] sm:$0xf]  ;;  %s583_s19 = sshll.u32 %s280_s18, 2  ;;  %s601_s22 = sshll.u32 %s826_s28, 6 }
  0x19   : > { %619 = vmatpush3.bf16.msra.mxu0 %v688_v2  ;;  %v297_v8 = vld [vmem:[%s290_s17] sm:$0xff]  ;;  %v481_v26 = vunpack.c.l.bf16 %v292_v7  ;;  %s282_s23 = scalar_lea.vmem [#allocation2], %s583_s19  ;;  %s905_s13 = scalar_lea.hbm %s947_s7, %s601_s22 }
  0x1a   : > { %301 = vperm.xlu0 %686, %v297_v8   ;;  %v590_v18 = vld [vmem:[%s944_s4] ss:$0 sm:$0xff]  ;;  %s508_s29 = sshll.u32 %s282_s23, 4  ;;  %s495_s14 = scalar_lea.sflag [#allocation3], %s280_s18  ;;  %s509_s29 = int_to_ptr.vmem [resolvable:$true] %s508_s29 }
  0x1b   : > { %627 = vmatpush3.bf16.msra.mxu1 %v690_v5  ;;  %v599_v28 = vld [vmem:[%s946_s6] ss:$0 sm:$0xff]  ;;  %s699_s15 = scalar_lea.vmem %s509_s29, 64  ;;  %s764_s28 = smov [#allocation2]  }
  0x1c   : > { %621 = vmatmul.mubr.msk.bf16.vlgmr.msra.gmra.mxu0 %vm323_vm1, %v292_v7  ;;  %628 = vmatprep.subr.bf16.mxu1 %v761_v1  ;;  %p700_p11 = scmp.ne.s32.totalorder %s509_s29, %s699_s15  ;;  %s703_s16 = sshll.u32 %s764_s28, 4  ;;  %s704_s16 = int_to_ptr.vmem [resolvable:$false] %s703_s16 }
  0x1d   : > { %s705_s17 = scalar_lea.vmem %s704_s16, 128  ;;  %p706_p0 = scmp.lt.s32.totalorder %s509_s29, %s704_s16 }
  0x1e   : > { %p701_p12 = pnand %p700_p11, %p843_p5  ;;  %p707_p1 = scmp.lt.s32.totalorder %s705_s17, %s699_s15 }
  0x1f   : > { %629 = vmatpush3.bf16.msra.mxu1 %v691_v6 }
  0x20   : > { %630 = vmatprep.subr.bf16.mxu1 %v761_v1  ;;  %p702_p13 = pneg %p701_p12  ;;  %p708_p2 = por %p707_p1, %p706_p0 }
  0x22   : > { %p709_p3 = pnand %p708_p2, %p702_p13 }
  0x23   : > { %631 = vmatpush3.bf16.msra.mxu1 %v692_v9 }
  0x24   : > { %632 = vmatprep.subr.bf16.mxu1 %v761_v1 }
  0x27   : > { %633 = vmatpush3.bf16.msra.mxu1 %v693_v10 }
  0x28   : > { %634 = vmatprep.subr.bf16.mxu1 %v761_v1 }
  0x2b   : > { %635 = vmatpush3.bf16.msra.mxu1 %v694_v11 }
  0x2c   : > { %636 = vmatprep.subr.bf16.mxu1 %v761_v1 }
  0x2f   : > { %637 = vmatpush3.bf16.msra.mxu1 %v695_v12 }
  0x30   : > { %638 = vmatprep.subr.bf16.mxu1 %v761_v1 }
  0x33   : > { %639 = vmatpush3.bf16.msra.mxu1 %v696_v13 }
  0x95   : > { %v302_v15 = vpop.permute.xlu0 %301 }
  0x96   : > { %v310_v16 = vmul.f32 %v586_v14, %v302_v15 }
  0xdc   : > { %v361_v17 = vpop.f32.mrf.mxu0 }
  0xdd   : > { %v362_v19 = vadd.f32 %v361_v17, %v310_v16 }
  0xde   : > { %v622_v20 = vpop.f32.mrf.mxu0 }
  0xdf   : > { %v374_v21 = vadd.f32 %v590_v18, %v362_v19 }
  0xe0   : > { %v364_v22 = vpop.f32.mrf.mxu0 }
  0xe1   : > { %697 = vtanh.f32 %v374_v21 }
  0xe2   : > { %v623_v23 = vpop.f32.mrf.mxu0 }
  0xee   : > { %v698_v24 = vpop.eup %697 }
  0xef   : > { %v376_v25 = vpack.c.bf16 %v698_v24, %v698_v24 }
  0xf1   : > { %641 = vmatmul.mubr.bf16.vlgmr.msra.gmra.mxu1 %v376_v25 }
 0x1b1   : > { %v475_v27 = vpop.f32.mrf.mxu1 }
 0x1b2   : > { %v482_v29 = vadd.f32 %v481_v26, %v475_v27 }
 0x1b3   : > { %v642_v30 = vpop.f32.mrf.mxu1 }
 0x1b4   : > { %v490_v31 = vadd.f32 %v599_v28, %v482_v29 }
 0x1b5   : > { %v478_v32 = vpop.f32.mrf.mxu1 }
 0x1b6   : > { %v491_v33 = vpack.c.bf16 %v490_v31, %v490_v31 }
 0x1b7   : > { %v643_v34 = vpop.f32.mrf.mxu1 }
 0x1b8   : > { %493 = vst.msk [vmem:[%s282_s23] sm:$0xf] %vm492_vm2, %v491_v33 }
 0x1b9   : > { %712 = shalt.err (!%p709_p3)
}
 0x1ba   : > { %s713_s19 = scalar_lea.hbm %s905_s13, 64  ;;  %s717_s21 = scalar_lea.hbm %s947_s7, 128 }
 0x1bb   : > { %p714_p4 = scmp.ne.s32.totalorder %s905_s13, %s713_s19  ;;  %p718_p9 = scmp.lt.s32.totalorder %s905_s13, %s947_s7 }
 0x1bc   : > { %p719_p10 = scmp.lt.s32.totalorder %s717_s21, %s713_s19 }
 0x1bd   : > { %p715_p7 = pnand %p714_p4, %p843_p5 }
 0x1be   : > { %p720_p11 = por %p719_p10, %p718_p9 }
 0x1bf   : > { %p716_p8 = pneg %p715_p7 }
 0x1c1   : > { %p721_p12 = pnand %p720_p11, %p716_p8 }
 0x1c3   : > { %724 = shalt.err (!%p721_p12)
}
 0x1c4   : > { %644 = dma.vmem_to_hbm [thread:$0]  (%p843_p5), %s509_s29, 64, %s905_s13, %s495_s14  }
 0x1c5 PF: > { %p650_p13 = scmp.ge.s32.totalorder %s759_s27, 2  ;;  %s520_s8 = sand.u32 1, %s747_s24  }
 0x1c6   : > { %s521_s9 = scalar_lea.sflag [#allocation3], %s520_s8 }
 0x1c7   : > { %p647_p0 = pnand %p650_p13, %p847_p6 }
 0x1c9   : > { %p648_p1 = pneg %p647_p0 }
 0x1cb   : > { %742 = dma.done.wait (%p648_p1), %s521_s9, 64  }
 0x1cc   : > { %744 = vsyncadd (%p648_p1), %s521_s9, 4294967232  ;;  %p17_p2 = scmp.ge.s32.totalorder %s830_s30, 4   ;;  %s950_s24 = smov %s751_s25 }
 0x1cd   : > { %s951_s25 = smov %s755_s26  ;;  %s952_s26 = smov %s841_s10 }
 0x1ce   : > { %s953_s27 = smov %s830_s30  ;;  %19 = sbr.rel (!%p17_p2) target bundleno = 3 (0x3), region = 86 }
 0x1d3   :  { %526 = vsyncpa [#allocation3], 1 }
 0x1d4   :  { %528 = vsyncpa [#allocation3 + $0x1], 1 }

</bundles_post_ra>
